<compile_context>
chip_gen: v7x
topology: tpu7x:2x2x1
jax: 0.10.0
libtpu: 0.0.40
codegen_flags: <defaults>
</compile_context>

<pallas_src>
import math

import jax
import jax.numpy as jnp
from jax.experimental import pallas as pl
from jax.experimental.pallas import tpu as pltpu

_LOG_2PI = math.log(2.0 * math.pi)
_SIGMA_P = 0.1                         # fixed transition std (synthesized)
_LOG_SIGMA_P = math.log(_SIGMA_P)
_INV_2SIG2 = 1.0 / (2.0 * _SIGMA_P * _SIGMA_P)
_EPS_SCALE = 1e-3
_MAX_TP = 2048                         # max pixel-tile lanes
_MAX_TM = 512                          # max row-tile


def _softplus(x):
    # numerically stable softplus; VPU/EUP-friendly ops only, kept in f32
    return jnp.maximum(x, 0.0) + jnp.log1p(jnp.exp(-jnp.abs(x)))


def _round_up(x, m):
    return (x + m - 1) // m * m


_VMEM_LIMIT_CACHE = None


def _vmem_limit_bytes():
    """Generation-aware scoped-VMEM budget (~3/4 of physical, capped)."""
    global _VMEM_LIMIT_CACHE
    if _VMEM_LIMIT_CACHE is None:
        cap = 64 * 1024 * 1024          # conservative fallback: v7x physical VMEM
        try:
            info = pltpu.get_tpu_info()
            cap = int(getattr(info, "vmem_capacity_bytes", cap) or cap)
        except Exception:               # non-TPU / interpret environments
            pass
        _VMEM_LIMIT_CACHE = min(int(cap * 3) // 4, 112 * 1024 * 1024)
    return _VMEM_LIMIT_CACHE


def _row_tile(m, q=16, max_tile=_MAX_TM):
    """Row tile: multiple of `q`, <= max_tile, and >=2 tiles when possible so a
    v7x chip can shard the 'parallel' row axis across its two TensorCores."""
    mq = _round_up(max(m, 1), q)
    if mq <= q:
        return mq
    return min(max_tile, _round_up((mq + 1) // 2, q))


def _p_tile(p, max_tile=_MAX_TP):
    """Largest multiple-of-128 divisor of p that is <= max_tile (else full p)."""
    if p % 128 != 0:
        return p
    t = (min(max_tile, p) // 128) * 128
    while t >= 128:
        if p % t == 0:
            return t
        t -= 128
    return p


# -----------------------------------------------------------------------------
# Fused kernel: encoder q(x|I) + reparameterized sample + decoder Gaussian
# log-likelihood, one single pass over the pixels.
#   grid = (row_tiles, P_tiles); P is the reduction axis ("arbitrary").
#   Fused weight columns: [0:D)=enc loc, [D:2D)=enc pre-scale, [2D:3D)=W_dec^T.
#   Packed output lanes:  [0:D)=x_q, [D:2D)=q_loc, [2D:3D)=q_scale,
#                         [3D:128)= -0.5*||I - dec||^2 (broadcast).
# -----------------------------------------------------------------------------
def _fused_enc_dec_kernel(i_ref, w_ref, benc_ref, bdec_ref, eps_ref,
                          gmat_ref, gvec_ref, out_ref, mat_acc, r_acc):
    k = pl.program_id(1)

    @pl.when(k == 0)
    def _():
        mat_acc[...] = jnp.zeros_like(mat_acc)
        r_acc[...] = jnp.zeros_like(r_acc)

    # single MXU matmul per pixel tile over the fused [W_loc | W_scale | W_dec^T]
    mat_acc[...] += jnp.dot(i_ref[...], w_ref[...],
                            preferred_element_type=jnp.float32)

    # VPU accumulation of ||I - b_dec||^2 (per-row, broadcast across 128 lanes)
    j = i_ref[...].astype(jnp.float32) - bdec_ref[...]
    r_acc[...] += jnp.sum(j * j, axis=-1, keepdims=True)

    @pl.when(k == pl.num_programs(1) - 1)
    def _():
        d = eps_ref.shape[1]
        pre = mat_acc[...]                                  # (TM, 3D)
        loc = pre[:, :d] + benc_ref[:, :d]
        raw = pre[:, d:2 * d] + benc_ref[:, d:]
        iwd = pre[:, 2 * d:]                                # I @ W_dec^T
        scale = _softplus(raw) + _EPS_SCALE
        x_q = loc + scale * eps_ref[...]                    # rsample

        # ||I - dec||^2 = r2 - 2 x.(I Wd^T) + 2 x.(Wd b_d^T) + x (Wd Wd^T) x^T
        xg = jnp.dot(x_q, gmat_ref[...], preferred_element_type=jnp.float32)
        quad = jnp.sum(x_q * xg, axis=-1, keepdims=True)
        cross = jnp.sum(x_q * iwd, axis=-1, keepdims=True)
        xgb = jnp.sum(x_q * gvec_ref[...], axis=-1, keepdims=True)
        sse = r_acc[:, :1] - 2.0 * cross + 2.0 * xgb + quad
        ll_var = -0.5 * sse      # constant -0.5*P*log(2*pi) is added host-side

        tm = out_ref.shape[0]
        pad = out_ref.shape[1] - 3 * d
        out_ref[...] = jnp.concatenate(
            [x_q, loc, scale, jnp.broadcast_to(ll_var, (tm, pad))], axis=-1)


def encode_decode_fused(obs, eps, params):
    """obs: (M, P) bf16 (or f32); eps: (M, D) f32 -> packed (M, 128) f32."""
    M, P = obs.shape
    D = eps.shape[1]
    TM = _row_tile(M, q=16)
    Mp = _round_up(M, TM)
    if Mp != M:
        obs = jnp.pad(obs, ((0, Mp - M), (0, 0)))
        eps = jnp.pad(eps, ((0, Mp - M), (0, 0)))
    TP = _p_tile(P)
    grid = (Mp // TM, P // TP)
    packw = _round_up(3 * D + 1, 128)

    # fused weight: encoder (P, 2D) columns + decoder-transpose (P, D) columns
    w_fused = jnp.concatenate([params["w_enc"], params["w_dec"].T],
                              axis=1).astype(obs.dtype)
    b_enc = params["b_enc"]                                  # (1, 2D) f32
    b_dec = params["b_dec"]                                  # (1, P)  f32
    # Gram / bias projection built from the weights as the MXU actually sees them
    wd_used = params["w_dec"].astype(obs.dtype).astype(jnp.float32)
    gmat = wd_used @ wd_used.T                               # (D, D)
    gvec = (wd_used @ b_dec.T).T                             # (1, D)

    packed = pl.pallas_call(
        _fused_enc_dec_kernel,
        out_shape=jax.ShapeDtypeStruct((Mp, packw), jnp.float32),
        grid_spec=pltpu.PrefetchScalarGridSpec(
            num_scalar_prefetch=0,
            grid=grid,
            in_specs=[
                pl.BlockSpec((TM, TP), lambda i, k: (i, k)),      # I tile (bf16)
                pl.BlockSpec((TP, 3 * D), lambda i, k: (k, 0)),   # fused weight
                pl.BlockSpec((1, 2 * D), lambda i, k: (0, 0)),    # enc bias
                pl.BlockSpec((1, TP), lambda i, k: (0, k)),       # dec bias tile
                pl.BlockSpec((TM, D), lambda i, k: (i, 0)),       # eps noise
                pl.BlockSpec((D, D), lambda i, k: (0, 0)),        # W_d W_d^T
                pl.BlockSpec((1, D), lambda i, k: (0, 0)),        # W_d b_d^T
            ],
            out_specs=pl.BlockSpec((TM, packw), lambda i, k: (i, 0)),
            scratch_shapes=[pltpu.VMEM((TM, 3 * D), jnp.float32),
                            pltpu.VMEM((TM, 128), jnp.float32)],
        ),
        compiler_params=pltpu.CompilerParams(
            dimension_semantics=("parallel", "arbitrary"),
            vmem_limit_bytes=_vmem_limit_bytes()),
    )(obs, w_fused, b_enc, b_dec, eps, gmat, gvec)
    return packed[:M]


# -----------------------------------------------------------------------------
# Dynamics + transition prior + KL for all t>=2 steps at once (row-gridded).
# Velocity net f(x, v, u) uses three (D, D) slabs -> no in-kernel concatenate.
# Output: per-row KL sum, lane-dense (rows, 128).
# -----------------------------------------------------------------------------
def _dyn_kl_kernel(x1_ref, x2_ref, u_ref, qloc_ref, qsc_ref, dt_ref, idt_ref,
                   wx_ref, wv_ref, wu_ref, bv_ref, kl_ref):
    x1 = x1_ref[...]
    u = u_ref[...]
    dt = dt_ref[...]

    # v_{t-1} = (x_{t-1} - x_{t-2}) / dt   (divide replaced by precomputed 1/dt)
    v_prev = (x1 - x2_ref[...]) * idt_ref[...]

    # f(x_{t-1}, v_{t-1}, u_{t-1}) -> positive diagonal
    f_lin = (jnp.dot(x1, wx_ref[...], preferred_element_type=jnp.float32)
             + jnp.dot(v_prev, wv_ref[...], preferred_element_type=jnp.float32)
             + jnp.dot(u, wu_ref[...], preferred_element_type=jnp.float32)
             + bv_ref[...])
    f = _softplus(f_lin) + _EPS_SCALE
    log_f = jnp.log(f)

    # v_t = v_{t-1} + dt * (A x + B v + C u)  with A=f, B=-log f, C=log f
    v_t = v_prev + dt * (f * x1 - log_f * v_prev + log_f * u)

    # transition prior p(x_t | x_{t-1}, u_{t-1}; v_t) = N(x_{t-1} + dt*v_t, sigma)
    p_loc = x1 + dt * v_t

    # KL( N(q_loc, q_scale) || N(p_loc, sigma_p) ), summed over D (lane-dense out)
    q_loc = qloc_ref[...]
    q_scale = qsc_ref[...]
    diff = q_loc - p_loc
    kl = (_LOG_SIGMA_P - jnp.log(q_scale)
          + (q_scale * q_scale + diff * diff) * _INV_2SIG2 - 0.5)
    kl_ref[...] = jnp.broadcast_to(jnp.sum(kl, axis=-1, keepdims=True),
                                   kl_ref.shape)


def dynamics_kl(x_tm1, x_tm2, u, q_loc, q_scale, dt_b, idt_b, params):
    M2, D = x_tm1.shape
    TM = _row_tile(M2, q=8)
    M2p = _round_up(M2, TM)
    if M2p != M2:
        pad = M2p - M2
        padz = lambda a: jnp.pad(a, ((0, pad), (0, 0)))
        pad1 = lambda a: jnp.pad(a, ((0, pad), (0, 0)), constant_values=1.0)
        x_tm1, x_tm2, u, q_loc = map(padz, (x_tm1, x_tm2, u, q_loc))
        q_scale, dt_b, idt_b = map(pad1, (q_scale, dt_b, idt_b))
    grid = (M2p // TM,)

    kl_rows = pl.pallas_call(
        _dyn_kl_kernel,
        out_shape=jax.ShapeDtypeStruct((M2p, 128), jnp.float32),
        grid_spec=pltpu.PrefetchScalarGridSpec(
            num_scalar_prefetch=0,
            grid=grid,
            in_specs=[
                pl.BlockSpec((TM, D), lambda i: (i, 0)),   # x_{t-1}
                pl.BlockSpec((TM, D), lambda i: (i, 0)),   # x_{t-2}
                pl.BlockSpec((TM, D), lambda i: (i, 0)),   # u_{t-1}
                pl.BlockSpec((TM, D), lambda i: (i, 0)),   # q loc
                pl.BlockSpec((TM, D), lambda i: (i, 0)),   # q scale
                pl.BlockSpec((TM, D), lambda i: (i, 0)),   # dt (lane-broadcast)
                pl.BlockSpec((TM, D), lambda i: (i, 0)),   # 1/dt
                pl.BlockSpec((D, D), lambda i: (0, 0)),    # W_x
                pl.BlockSpec((D, D), lambda i: (0, 0)),    # W_v
                pl.BlockSpec((D, D), lambda i: (0, 0)),    # W_u
                pl.BlockSpec((1, D), lambda i: (0, 0)),    # b_vel
            ],
            out_specs=pl.BlockSpec((TM, 128), lambda i: (i, 0)),
        ),
        compiler_params=pltpu.CompilerParams(
            dimension_semantics=("parallel",),
            vmem_limit_bytes=_vmem_limit_bytes()),
    )(x_tm1, x_tm2, u, q_loc, q_scale, dt_b, idt_b,
      params["w_vel_x"], params["w_vel_v"], params["w_vel_u"], params["b_vel"])
    return kl_rows[:M2, 0]


# -----------------------------------------------------------------------------
# NewtonianVAEV2.forward — 2 pallas_calls total, no per-timestep Python loop.
# -----------------------------------------------------------------------------
def newtonian_vae_v2_forward(params, action, observation, delta, eps_noise):
    """action: (T, N, D); observation: (T, N, C, H, W) [bf16 preferred]; delta: (T,)."""
    T, N, D = action.shape
    P = int(observation.shape[2] * observation.shape[3] * observation.shape[4])

    # Stream observations in bf16 (caller should store them in bf16 to avoid a
    # cast pass); f32 observations are also accepted and used as-is.
    obs = observation.reshape(T * N, P)
    if obs.dtype != jnp.bfloat16 and obs.dtype != jnp.float32:
        obs = obs.astype(jnp.float32)
    eps = eps_noise.reshape(T * N, D).astype(jnp.float32)

    # q(x_t|I_t) sample + posterior stats + recon log-likelihood, single pass.
    packed = encode_decode_fused(obs, eps, params)           # (T*N, 128)
    x_q = packed[:, :D]
    q_loc = packed[:, D:2 * D]
    q_scale = packed[:, 2 * D:3 * D]
    ll_var = packed[:, 3 * D]                                # -0.5*||I - dec||^2

    if T <= 2:
        zero = jnp.float32(0.0)
        return zero, zero, zero

    M2 = (T - 2) * N

    # E_ll = sum_t mean_N sum_pixels log N(I_t | dec, 1), for t >= 2 only
    E_ll_sum = (jnp.sum(ll_var[2 * N:]) / N
                + jnp.float32((T - 2) * (-0.5 * P * _LOG_2PI)))

    # shifted latents for the (embarrassingly parallel) dynamics / KL terms
    x_all = x_q.reshape(T, N, D)
    x_tm1 = x_all[1:T - 1].reshape(M2, D)
    x_tm2 = x_all[0:T - 2].reshape(M2, D)
    u = action[2:].reshape(M2, D).astype(jnp.float32)
    dt_col = jnp.repeat(delta[2:].astype(jnp.float32), N).reshape(M2, 1)
    dt_b = jnp.broadcast_to(dt_col, (M2, D))
    idt_b = jnp.broadcast_to(1.0 / dt_col, (M2, D))

    kl_rows = dynamics_kl(x_tm1, x_tm2, u, q_loc[2 * N:], q_scale[2 * N:],
                          dt_b, idt_b, params)               # (M2,)
    E_kl_sum = jnp.sum(kl_rows) / N

    E_sum = E_ll_sum - E_kl_sum
    T_f = jnp.float32(T)
    return E_sum / T_f, E_ll_sum / T_f, E_kl_sum / T_f


def init_params(key, D, P):
    ks = jax.random.split(key, 5)
    return {
        # fused encoder weight: columns [0:D] -> loc, [D:2D] -> scale (pre-softplus)
        "w_enc": jax.random.normal(ks[0], (P, 2 * D), jnp.float32) / math.sqrt(P),
        "b_enc": jnp.zeros((1, 2 * D), jnp.float32),
        "w_dec": jax.random.normal(ks[1], (D, P), jnp.float32) / math.sqrt(D),
        "b_dec": jnp.zeros((1, P), jnp.float32),
        # velocity-net weights over x, v, u (three (D,D) slabs)
        "w_vel_x": jax.random.normal(ks[2], (D, D), jnp.float32) / math.sqrt(3 * D),
        "w_vel_v": jax.random.normal(ks[3], (D, D), jnp.float32) / math.sqrt(3 * D),
        "w_vel_u": jax.random.normal(ks[4], (D, D), jnp.float32) / math.sqrt(3 * D),
        "b_vel": jnp.zeros((1, D), jnp.float32),
    }


if __name__ == "__main__":
    T, N, C, H, W, D = 8, 2, 4, 16, 16, 4
    P = C * H * W

    key = jax.random.PRNGKey(0)
    k_param, k_act, k_obs, k_eps = jax.random.split(key, 4)

    params = init_params(k_param, D, P)
    action = jax.random.normal(k_act, (T, N, D), jnp.float32)
    # observations stored / fed in bf16 so the kernels stream half the bytes
    observation = jax.random.normal(
        k_obs, (T, N, C, H, W), jnp.float32).astype(jnp.bfloat16)
    delta = jnp.full((T,), 0.1, jnp.float32)
    eps_noise = jax.random.normal(k_eps, (T, N, D), jnp.float32)   # reparam noise

    fwd = jax.jit(newtonian_vae_v2_forward)
    E, E_ll, E_kl = fwd(params, action, observation, delta, eps_noise)
    jax.block_until_ready((E, E_ll, E_kl))

    assert E.shape == () and E_ll.shape == () and E_kl.shape == ()
    assert bool(jnp.isfinite(E)) and bool(jnp.isfinite(E_ll)) and bool(jnp.isfinite(E_kl))
    print("KERNEL_OK")
</pallas_src>

<mosaic_0001>
module attributes {stable_mosaic.version = 11 : i64} {
  func.func @_fused_enc_dec_kernel(%arg0: i32, %arg1: i32, %arg2: memref<16x1024xbf16, #tpu.memory_space<vmem>>, %arg3: memref<1024x12xbf16, #tpu.memory_space<vmem>>, %arg4: memref<1x8xf32, #tpu.memory_space<vmem>>, %arg5: memref<1x1024xf32, #tpu.memory_space<vmem>>, %arg6: memref<16x4xf32, #tpu.memory_space<vmem>>, %arg7: memref<4x4xf32, #tpu.memory_space<vmem>>, %arg8: memref<1x4xf32, #tpu.memory_space<vmem>>, %arg9: memref<16x128xf32, #tpu.memory_space<vmem>>, %arg10: memref<16x12xf32, #tpu.memory_space<vmem>>, %arg11: memref<16x128xf32, #tpu.memory_space<vmem>>) attributes {dimension_semantics = [#tpu.dimension_semantics<parallel>, #tpu.dimension_semantics<arbitrary>], iteration_bounds = array<i64: 1, 1>, scalar_prefetch = 0 : i64, scratch_operands = 2 : i64, tpu.core_type = #tpu.core_type<tc>, window_params = [{transform_indices = @transform_0, window_bounds = array<i64: 16, 1024>}, {transform_indices = @transform_1, window_bounds = array<i64: 1024, 12>}, {pipeline_mode = #tpu.pipeline_mode<synchronous>, transform_indices = @transform_2, window_bounds = array<i64: 1, 8>}, {transform_indices = @transform_3, window_bounds = array<i64: 1, 1024>}, {transform_indices = @transform_4, window_bounds = array<i64: 16, 4>}, {pipeline_mode = #tpu.pipeline_mode<synchronous>, transform_indices = @transform_5, window_bounds = array<i64: 4, 4>}, {pipeline_mode = #tpu.pipeline_mode<synchronous>, transform_indices = @transform_6, window_bounds = array<i64: 1, 4>}, {transform_indices = @transform_7, window_bounds = array<i64: 16, 128>}]} {
    %c0_i32 = arith.constant 0 : i32
    %0 = arith.cmpi eq, %arg1, %c0_i32 : i32
    %1 = arith.extui %0 : i1 to i32
    %c0_i32_0 = arith.constant 0 : i32
    %2 = arith.cmpi ne, %1, %c0_i32_0 : i32
    scf.if %2 {
      %cst_19 = arith.constant 0.000000e+00 : f32
      %24 = vector.broadcast %cst_19 : f32 to vector<16x12xf32>
      %c0_20 = arith.constant 0 : index
      %c0_21 = arith.constant 0 : index
      %25 = vector.load %arg10[%c0_20, %c0_21] : memref<16x12xf32, #tpu.memory_space<vmem>>, vector<16x12xf32>
      tpu.vector_store %arg10[%c0_20, %c0_21], %24 {strides = array<i32>} : memref<16x12xf32, #tpu.memory_space<vmem>>, vector<16x12xf32>,
      %cst_22 = arith.constant 0.000000e+00 : f32
      %26 = vector.broadcast %cst_22 : f32 to vector<16x128xf32>
      %c0_23 = arith.constant 0 : index
      %c0_24 = arith.constant 0 : index
      %27 = vector.load %arg11[%c0_23, %c0_24] : memref<16x128xf32, #tpu.memory_space<vmem>>, vector<16x128xf32>
      tpu.vector_store %arg11[%c0_23, %c0_24], %26 {strides = array<i32>} : memref<16x128xf32, #tpu.memory_space<vmem>>, vector<16x128xf32>,
    } else {
    }
    %c0 = arith.constant 0 : index
    %c0_1 = arith.constant 0 : index
    %3 = vector.load %arg10[%c0, %c0_1] : memref<16x12xf32, #tpu.memory_space<vmem>>, vector<16x12xf32>
    %c0_2 = arith.constant 0 : index
    %c0_3 = arith.constant 0 : index
    %4 = vector.load %arg2[%c0_2, %c0_3] : memref<16x1024xbf16, #tpu.memory_space<vmem>>, vector<16x1024xbf16>
    %c0_4 = arith.constant 0 : index
    %c0_5 = arith.constant 0 : index
    %5 = vector.load %arg3[%c0_4, %c0_5] : memref<1024x12xbf16, #tpu.memory_space<vmem>>, vector<1024x12xbf16>
    %cst = arith.constant dense<0.000000e+00> : vector<16x12xf32>
    %6 = tpu.matmul %4, %5, %cst {dimension_numbers = #tpu.dot_dimension_numbers<[1], [0], [0], [1], [0, 0, 1, 1], [], []>} : vector<16x1024xbf16>, vector<1024x12xbf16>, vector<16x12xf32> -> vector<16x12xf32>
    %7 = arith.addf %3, %6 : vector<16x12xf32>
    %c0_6 = arith.constant 0 : index
    %c0_7 = arith.constant 0 : index
    %8 = vector.load %arg10[%c0_6, %c0_7] : memref<16x12xf32, #tpu.memory_space<vmem>>, vector<16x12xf32>
    tpu.vector_store %arg10[%c0_6, %c0_7], %7 {strides = array<i32>} : memref<16x12xf32, #tpu.memory_space<vmem>>, vector<16x12xf32>,
    %c0_8 = arith.constant 0 : index
    %c0_9 = arith.constant 0 : index
    %9 = vector.load %arg2[%c0_8, %c0_9] : memref<16x1024xbf16, #tpu.memory_space<vmem>>, vector<16x1024xbf16>
    %10 = arith.extf %9 : vector<16x1024xbf16> to vector<16x1024xf32>
    %c0_10 = arith.constant 0 : index
    %c0_11 = arith.constant 0 : index
    %11 = vector.load %arg5[%c0_10, %c0_11] : memref<1x1024xf32, #tpu.memory_space<vmem>>, vector<1x1024xf32>
    %12 = vector.broadcast %11 : vector<1x1024xf32> to vector<16x1024xf32>
    %13 = arith.subf %10, %12 : vector<16x1024xf32>
    %c0_12 = arith.constant 0 : index
    %c0_13 = arith.constant 0 : index
    %14 = vector.load %arg11[%c0_12, %c0_13] : memref<16x128xf32, #tpu.memory_space<vmem>>, vector<16x128xf32>
    %15 = arith.mulf %13, %13 : vector<16x1024xf32>
    %cst_14 = arith.constant dense<0.000000e+00> : vector<16xf32>
    %16 = vector.multi_reduction <add>, %15, %cst_14 [1] : vector<16x1024xf32> to vector<16xf32>
    %17 = vector.shape_cast %16 : vector<16xf32> to vector<16x1xf32>
    %18 = vector.broadcast %17 : vector<16x1xf32> to vector<16x128xf32>
    %19 = arith.addf %14, %18 : vector<16x128xf32>
    %c0_15 = arith.constant 0 : index
    %c0_16 = arith.constant 0 : index
    %20 = vector.load %arg11[%c0_15, %c0_16] : memref<16x128xf32, #tpu.memory_space<vmem>>, vector<16x128xf32>
    tpu.vector_store %arg11[%c0_15, %c0_16], %19 {strides = array<i32>} : memref<16x128xf32, #tpu.memory_space<vmem>>, vector<16x128xf32>,
    %c0_i32_17 = arith.constant 0 : i32
    %21 = arith.cmpi eq, %arg1, %c0_i32_17 : i32
    %22 = arith.extui %21 : i1 to i32
    %c0_i32_18 = arith.constant 0 : i32
    %23 = arith.cmpi ne, %22, %c0_i32_18 : i32
    scf.if %23 {
      %c0_19 = arith.constant 0 : index
      %c0_20 = arith.constant 0 : index
      %24 = vector.load %arg10[%c0_19, %c0_20] : memref<16x12xf32, #tpu.memory_space<vmem>>, vector<16x12xf32>
      %25 = vector.extract_strided_slice %24 {offsets = [0, 0], sizes = [16, 4], strides = [1, 1]} : vector<16x12xf32> to vector<16x4xf32>
      %c0_21 = arith.constant 0 : index
      %c0_22 = arith.constant 0 : index
      %26 = vector.load %arg4[%c0_21, %c0_22] : memref<1x8xf32, #tpu.memory_space<vmem>>, vector<1x4xf32>
      %27 = vector.broadcast %26 : vector<1x4xf32> to vector<16x4xf32>
      %28 = arith.addf %25, %27 : vector<16x4xf32>
      %29 = vector.extract_strided_slice %24 {offsets = [0, 4], sizes = [16, 4], strides = [1, 1]} : vector<16x12xf32> to vector<16x4xf32>
      %c0_23 = arith.constant 0 : index
      %c4 = arith.constant 4 : index
      %30 = vector.load %arg4[%c0_23, %c4] : memref<1x8xf32, #tpu.memory_space<vmem>>, vector<1x4xf32>
      %31 = vector.broadcast %30 : vector<1x4xf32> to vector<16x4xf32>
      %32 = arith.addf %29, %31 : vector<16x4xf32>
      %33 = vector.extract_strided_slice %24 {offsets = [0, 8], sizes = [16, 4], strides = [1, 1]} : vector<16x12xf32> to vector<16x4xf32>
      %cst_24 = arith.constant 0.000000e+00 : f32
      %34 = vector.broadcast %cst_24 : f32 to vector<16x4xf32>
      %35 = arith.maximumf %32, %34 : vector<16x4xf32>
      %36 = math.absf %32 : vector<16x4xf32>
      %cst_25 = arith.constant 0.000000e+00 : f32
      %37 = vector.broadcast %cst_25 : f32 to vector<16x4xf32>
      %38 = arith.subf %37, %36 : vector<16x4xf32>
      %39 = math.exp %38 : vector<16x4xf32>
      %40 = math.log1p %39 : vector<16x4xf32>
      %41 = arith.addf %35, %40 : vector<16x4xf32>
      %cst_26 = arith.constant 1.000000e-03 : f32
      %42 = vector.broadcast %cst_26 : f32 to vector<16x4xf32>
      %43 = arith.addf %41, %42 : vector<16x4xf32>
      %c0_27 = arith.constant 0 : index
      %c0_28 = arith.constant 0 : index
      %44 = vector.load %arg6[%c0_27, %c0_28] : memref<16x4xf32, #tpu.memory_space<vmem>>, vector<16x4xf32>
      %45 = arith.mulf %43, %44 : vector<16x4xf32>
      %46 = arith.addf %28, %45 : vector<16x4xf32>
      %c0_29 = arith.constant 0 : index
      %c0_30 = arith.constant 0 : index
      %47 = vector.load %arg7[%c0_29, %c0_30] : memref<4x4xf32, #tpu.memory_space<vmem>>, vector<4x4xf32>
      %cst_31 = arith.constant dense<0.000000e+00> : vector<16x4xf32>
      %48 = tpu.matmul %46, %47, %cst_31 {dimension_numbers = #tpu.dot_dimension_numbers<[1], [0], [0], [1], [0, 0, 1, 1], [], []>} : vector<16x4xf32>, vector<4x4xf32>, vector<16x4xf32> -> vector<16x4xf32>
      %49 = arith.mulf %46, %48 : vector<16x4xf32>
      %cst_32 = arith.constant dense<0.000000e+00> : vector<16xf32>
      %50 = vector.multi_reduction <add>, %49, %cst_32 [1] : vector<16x4xf32> to vector<16xf32>
      %51 = vector.shape_cast %50 : vector<16xf32> to vector<16x1xf32>
      %52 = arith.mulf %46, %33 : vector<16x4xf32>
      %cst_33 = arith.constant dense<0.000000e+00> : vector<16xf32>
      %53 = vector.multi_reduction <add>, %52, %cst_33 [1] : vector<16x4xf32> to vector<16xf32>
      %54 = vector.shape_cast %53 : vector<16xf32> to vector<16x1xf32>
      %c0_34 = arith.constant 0 : index
      %c0_35 = arith.constant 0 : index
      %55 = vector.load %arg8[%c0_34, %c0_35] : memref<1x4xf32, #tpu.memory_space<vmem>>, vector<1x4xf32>
      %56 = vector.broadcast %55 : vector<1x4xf32> to vector<16x4xf32>
      %57 = arith.mulf %46, %56 : vector<16x4xf32>
      %cst_36 = arith.constant dense<0.000000e+00> : vector<16xf32>
      %58 = vector.multi_reduction <add>, %57, %cst_36 [1] : vector<16x4xf32> to vector<16xf32>
      %59 = vector.shape_cast %58 : vector<16xf32> to vector<16x1xf32>
      %c0_37 = arith.constant 0 : index
      %c0_38 = arith.constant 0 : index
      %60 = vector.load %arg11[%c0_37, %c0_38] : memref<16x128xf32, #tpu.memory_space<vmem>>, vector<16x1xf32>
      %cst_39 = arith.constant 2.000000e+00 : f32
      %61 = vector.broadcast %cst_39 : f32 to vector<16x1xf32>
      %62 = arith.mulf %61, %54 : vector<16x1xf32>
      %63 = arith.subf %60, %62 : vector<16x1xf32>
      %cst_40 = arith.constant 2.000000e+00 : f32
      %64 = vector.broadcast %cst_40 : f32 to vector<16x1xf32>
      %65 = arith.mulf %64, %59 : vector<16x1xf32>
      %66 = arith.addf %63, %65 : vector<16x1xf32>
      %67 = arith.addf %66, %51 : vector<16x1xf32>
      %cst_41 = arith.constant -5.000000e-01 : f32
      %68 = vector.broadcast %cst_41 : f32 to vector<16x1xf32>
      %69 = arith.mulf %68, %67 : vector<16x1xf32>
      %70 = vector.shape_cast %69 : vector<16x1xf32> to vector<16x1xf32>
      %71 = vector.broadcast %70 : vector<16x1xf32> to vector<16x116xf32>
      %72 = tpu.concatenate %46, %28, %43, %71 in 1 : vector<16x4xf32>, vector<16x4xf32>, vector<16x4xf32>, vector<16x116xf32> -> vector<16x128xf32>
      %c0_42 = arith.constant 0 : index
      %c0_43 = arith.constant 0 : index
      %73 = vector.load %arg9[%c0_42, %c0_43] : memref<16x128xf32, #tpu.memory_space<vmem>>, vector<16x128xf32>
      tpu.vector_store %arg9[%c0_42, %c0_43], %72 {strides = array<i32>} : memref<16x128xf32, #tpu.memory_space<vmem>>, vector<16x128xf32>,
    } else {
    }
    return
  }
  func.func @transform_0(%arg0: i32, %arg1: i32) -> (i32, i32) {
    %c0_i32 = arith.constant 0 : i32
    return %arg0, %arg1 : i32, i32
  }
  func.func @transform_1(%arg0: i32, %arg1: i32) -> (i32, i32) {
    %c0_i32 = arith.constant 0 : i32
    %c0_i32_0 = arith.constant 0 : i32
    return %arg1, %c0_i32 : i32, i32
  }
  func.func @transform_2(%arg0: i32, %arg1: i32) -> (i32, i32) {
    %c0_i32 = arith.constant 0 : i32
    %c0_i32_0 = arith.constant 0 : i32
    %c0_i32_1 = arith.constant 0 : i32
    return %c0_i32, %c0_i32_0 : i32, i32
  }
  func.func @transform_3(%arg0: i32, %arg1: i32) -> (i32, i32) {
    %c0_i32 = arith.constant 0 : i32
    %c0_i32_0 = arith.constant 0 : i32
    return %c0_i32, %arg1 : i32, i32
  }
  func.func @transform_4(%arg0: i32, %arg1: i32) -> (i32, i32) {
    %c0_i32 = arith.constant 0 : i32
    %c0_i32_0 = arith.constant 0 : i32
    return %arg0, %c0_i32 : i32, i32
  }
  func.func @transform_5(%arg0: i32, %arg1: i32) -> (i32, i32) {
    %c0_i32 = arith.constant 0 : i32
    %c0_i32_0 = arith.constant 0 : i32
    %c0_i32_1 = arith.constant 0 : i32
    return %c0_i32, %c0_i32_0 : i32, i32
  }
  func.func @transform_6(%arg0: i32, %arg1: i32) -> (i32, i32) {
    %c0_i32 = arith.constant 0 : i32
    %c0_i32_0 = arith.constant 0 : i32
    %c0_i32_1 = arith.constant 0 : i32
    return %c0_i32, %c0_i32_0 : i32, i32
  }
  func.func @transform_7(%arg0: i32, %arg1: i32) -> (i32, i32) {
    %c0_i32 = arith.constant 0 : i32
    %c0_i32_0 = arith.constant 0 : i32
    return %arg0, %c0_i32 : i32, i32
  }
}

module attributes {stable_mosaic.version = 11 : i64} {
  func.func @_dyn_kl_kernel(%arg0: i32, %arg1: memref<8x4xf32, #tpu.memory_space<vmem>>, %arg2: memref<8x4xf32, #tpu.memory_space<vmem>>, %arg3: memref<8x4xf32, #tpu.memory_space<vmem>>, %arg4: memref<8x4xf32, #tpu.memory_space<vmem>>, %arg5: memref<8x4xf32, #tpu.memory_space<vmem>>, %arg6: memref<8x4xf32, #tpu.memory_space<vmem>>, %arg7: memref<8x4xf32, #tpu.memory_space<vmem>>, %arg8: memref<4x4xf32, #tpu.memory_space<vmem>>, %arg9: memref<4x4xf32, #tpu.memory_space<vmem>>, %arg10: memref<4x4xf32, #tpu.memory_space<vmem>>, %arg11: memref<1x4xf32, #tpu.memory_space<vmem>>, %arg12: memref<8x128xf32, #tpu.memory_space<vmem>>) attributes {dimension_semantics = [#tpu.dimension_semantics<parallel>], iteration_bounds = array<i64: 2>, scalar_prefetch = 0 : i64, scratch_operands = 0 : i64, tpu.core_type = #tpu.core_type<tc>, window_params = [{transform_indices = @transform_0, window_bounds = array<i64: 8, 4>}, {transform_indices = @transform_1, window_bounds = array<i64: 8, 4>}, {transform_indices = @transform_2, window_bounds = array<i64: 8, 4>}, {transform_indices = @transform_3, window_bounds = array<i64: 8, 4>}, {transform_indices = @transform_4, window_bounds = array<i64: 8, 4>}, {transform_indices = @transform_5, window_bounds = array<i64: 8, 4>}, {transform_indices = @transform_6, window_bounds = array<i64: 8, 4>}, {pipeline_mode = #tpu.pipeline_mode<synchronous>, transform_indices = @transform_7, window_bounds = array<i64: 4, 4>}, {pipeline_mode = #tpu.pipeline_mode<synchronous>, transform_indices = @transform_8, window_bounds = array<i64: 4, 4>}, {pipeline_mode = #tpu.pipeline_mode<synchronous>, transform_indices = @transform_9, window_bounds = array<i64: 4, 4>}, {pipeline_mode = #tpu.pipeline_mode<synchronous>, transform_indices = @transform_10, window_bounds = array<i64: 1, 4>}, {transform_indices = @transform_11, window_bounds = array<i64: 8, 128>}]} {
    %c0 = arith.constant 0 : index
    %c0_0 = arith.constant 0 : index
    %0 = vector.load %arg1[%c0, %c0_0] : memref<8x4xf32, #tpu.memory_space<vmem>>, vector<8x4xf32>
    %c0_1 = arith.constant 0 : index
    %c0_2 = arith.constant 0 : index
    %1 = vector.load %arg3[%c0_1, %c0_2] : memref<8x4xf32, #tpu.memory_space<vmem>>, vector<8x4xf32>
    %c0_3 = arith.constant 0 : index
    %c0_4 = arith.constant 0 : index
    %2 = vector.load %arg6[%c0_3, %c0_4] : memref<8x4xf32, #tpu.memory_space<vmem>>, vector<8x4xf32>
    %c0_5 = arith.constant 0 : index
    %c0_6 = arith.constant 0 : index
    %3 = vector.load %arg2[%c0_5, %c0_6] : memref<8x4xf32, #tpu.memory_space<vmem>>, vector<8x4xf32>
    %4 = arith.subf %0, %3 : vector<8x4xf32>
    %c0_7 = arith.constant 0 : index
    %c0_8 = arith.constant 0 : index
    %5 = vector.load %arg7[%c0_7, %c0_8] : memref<8x4xf32, #tpu.memory_space<vmem>>, vector<8x4xf32>
    %6 = arith.mulf %4, %5 : vector<8x4xf32>
    %c0_9 = arith.constant 0 : index
    %c0_10 = arith.constant 0 : index
    %7 = vector.load %arg8[%c0_9, %c0_10] : memref<4x4xf32, #tpu.memory_space<vmem>>, vector<4x4xf32>
    %cst = arith.constant dense<0.000000e+00> : vector<8x4xf32>
    %8 = tpu.matmul %0, %7, %cst {dimension_numbers = #tpu.dot_dimension_numbers<[1], [0], [0], [1], [0, 0, 1, 1], [], []>} : vector<8x4xf32>, vector<4x4xf32>, vector<8x4xf32> -> vector<8x4xf32>
    %c0_11 = arith.constant 0 : index
    %c0_12 = arith.constant 0 : index
    %9 = vector.load %arg9[%c0_11, %c0_12] : memref<4x4xf32, #tpu.memory_space<vmem>>, vector<4x4xf32>
    %cst_13 = arith.constant dense<0.000000e+00> : vector<8x4xf32>
    %10 = tpu.matmul %6, %9, %cst_13 {dimension_numbers = #tpu.dot_dimension_numbers<[1], [0], [0], [1], [0, 0, 1, 1], [], []>} : vector<8x4xf32>, vector<4x4xf32>, vector<8x4xf32> -> vector<8x4xf32>
    %11 = arith.addf %8, %10 : vector<8x4xf32>
    %c0_14 = arith.constant 0 : index
    %c0_15 = arith.constant 0 : index
    %12 = vector.load %arg10[%c0_14, %c0_15] : memref<4x4xf32, #tpu.memory_space<vmem>>, vector<4x4xf32>
    %cst_16 = arith.constant dense<0.000000e+00> : vector<8x4xf32>
    %13 = tpu.matmul %1, %12, %cst_16 {dimension_numbers = #tpu.dot_dimension_numbers<[1], [0], [0], [1], [0, 0, 1, 1], [], []>} : vector<8x4xf32>, vector<4x4xf32>, vector<8x4xf32> -> vector<8x4xf32>
    %14 = arith.addf %11, %13 : vector<8x4xf32>
    %c0_17 = arith.constant 0 : index
    %c0_18 = arith.constant 0 : index
    %15 = vector.load %arg11[%c0_17, %c0_18] : memref<1x4xf32, #tpu.memory_space<vmem>>, vector<1x4xf32>
    %16 = vector.broadcast %15 : vector<1x4xf32> to vector<8x4xf32>
    %17 = arith.addf %14, %16 : vector<8x4xf32>
    %cst_19 = arith.constant 0.000000e+00 : f32
    %18 = vector.broadcast %cst_19 : f32 to vector<8x4xf32>
    %19 = arith.maximumf %17, %18 : vector<8x4xf32>
    %20 = math.absf %17 : vector<8x4xf32>
    %cst_20 = arith.constant 0.000000e+00 : f32
    %21 = vector.broadcast %cst_20 : f32 to vector<8x4xf32>
    %22 = arith.subf %21, %20 : vector<8x4xf32>
    %23 = math.exp %22 : vector<8x4xf32>
    %24 = math.log1p %23 : vector<8x4xf32>
    %25 = arith.addf %19, %24 : vector<8x4xf32>
    %cst_21 = arith.constant 1.000000e-03 : f32
    %26 = vector.broadcast %cst_21 : f32 to vector<8x4xf32>
    %27 = arith.addf %25, %26 : vector<8x4xf32>
    %28 = math.log %27 : vector<8x4xf32>
    %29 = arith.mulf %27, %0 : vector<8x4xf32>
    %30 = arith.mulf %28, %6 : vector<8x4xf32>
    %31 = arith.subf %29, %30 : vector<8x4xf32>
    %32 = arith.mulf %28, %1 : vector<8x4xf32>
    %33 = arith.addf %31, %32 : vector<8x4xf32>
    %34 = arith.mulf %2, %33 : vector<8x4xf32>
    %35 = arith.addf %6, %34 : vector<8x4xf32>
    %36 = arith.mulf %2, %35 : vector<8x4xf32>
    %37 = arith.addf %0, %36 : vector<8x4xf32>
    %c0_22 = arith.constant 0 : index
    %c0_23 = arith.constant 0 : index
    %38 = vector.load %arg4[%c0_22, %c0_23] : memref<8x4xf32, #tpu.memory_space<vmem>>, vector<8x4xf32>
    %c0_24 = arith.constant 0 : index
    %c0_25 = arith.constant 0 : index
    %39 = vector.load %arg5[%c0_24, %c0_25] : memref<8x4xf32, #tpu.memory_space<vmem>>, vector<8x4xf32>
    %40 = arith.subf %38, %37 : vector<8x4xf32>
    %41 = math.log %39 : vector<8x4xf32>
    %cst_26 = arith.constant -2.30258512 : f32
    %42 = vector.broadcast %cst_26 : f32 to vector<8x4xf32>
    %43 = arith.subf %42, %41 : vector<8x4xf32>
    %44 = arith.mulf %39, %39 : vector<8x4xf32>
    %45 = arith.mulf %40, %40 : vector<8x4xf32>
    %46 = arith.addf %44, %45 : vector<8x4xf32>
    %cst_27 = arith.constant 5.000000e+01 : f32
    %47 = vector.broadcast %cst_27 : f32 to vector<8x4xf32>
    %48 = arith.mulf %46, %47 : vector<8x4xf32>
    %49 = arith.addf %43, %48 : vector<8x4xf32>
    %cst_28 = arith.constant 5.000000e-01 : f32
    %50 = vector.broadcast %cst_28 : f32 to vector<8x4xf32>
    %51 = arith.subf %49, %50 : vector<8x4xf32>
    %cst_29 = arith.constant dense<0.000000e+00> : vector<8xf32>
    %52 = vector.multi_reduction <add>, %51, %cst_29 [1] : vector<8x4xf32> to vector<8xf32>
    %53 = vector.shape_cast %52 : vector<8xf32> to vector<8x1xf32>
    %54 = vector.shape_cast %53 : vector<8x1xf32> to vector<8x1xf32>
    %55 = vector.broadcast %54 : vector<8x1xf32> to vector<8x128xf32>
    %c0_30 = arith.constant 0 : index
    %c0_31 = arith.constant 0 : index
    %56 = vector.load %arg12[%c0_30, %c0_31] : memref<8x128xf32, #tpu.memory_space<vmem>>, vector<8x128xf32>
    tpu.vector_store %arg12[%c0_30, %c0_31], %55 {strides = array<i32>} : memref<8x128xf32, #tpu.memory_space<vmem>>, vector<8x128xf32>,
    return
  }
  func.func @transform_0(%arg0: i32) -> (i32, i32) {
    %c0_i32 = arith.constant 0 : i32
    %c0_i32_0 = arith.constant 0 : i32
    return %arg0, %c0_i32 : i32, i32
  }
  func.func @transform_1(%arg0: i32) -> (i32, i32) {
    %c0_i32 = arith.constant 0 : i32
    %c0_i32_0 = arith.constant 0 : i32
    return %arg0, %c0_i32 : i32, i32
  }
  func.func @transform_2(%arg0: i32) -> (i32, i32) {
    %c0_i32 = arith.constant 0 : i32
    %c0_i32_0 = arith.constant 0 : i32
    return %arg0, %c0_i32 : i32, i32
  }
  func.func @transform_3(%arg0: i32) -> (i32, i32) {
    %c0_i32 = arith.constant 0 : i32
    %c0_i32_0 = arith.constant 0 : i32
    return %arg0, %c0_i32 : i32, i32
  }
  func.func @transform_4(%arg0: i32) -> (i32, i32) {
    %c0_i32 = arith.constant 0 : i32
    %c0_i32_0 = arith.constant 0 : i32
    return %arg0, %c0_i32 : i32, i32
  }
  func.func @transform_5(%arg0: i32) -> (i32, i32) {
    %c0_i32 = arith.constant 0 : i32
    %c0_i32_0 = arith.constant 0 : i32
    return %arg0, %c0_i32 : i32, i32
  }
  func.func @transform_6(%arg0: i32) -> (i32, i32) {
    %c0_i32 = arith.constant 0 : i32
    %c0_i32_0 = arith.constant 0 : i32
    return %arg0, %c0_i32 : i32, i32
  }
  func.func @transform_7(%arg0: i32) -> (i32, i32) {
    %c0_i32 = arith.constant 0 : i32
    %c0_i32_0 = arith.constant 0 : i32
    %c0_i32_1 = arith.constant 0 : i32
    return %c0_i32, %c0_i32_0 : i32, i32
  }
  func.func @transform_8(%arg0: i32) -> (i32, i32) {
    %c0_i32 = arith.constant 0 : i32
    %c0_i32_0 = arith.constant 0 : i32
    %c0_i32_1 = arith.constant 0 : i32
    return %c0_i32, %c0_i32_0 : i32, i32
  }
  func.func @transform_9(%arg0: i32) -> (i32, i32) {
    %c0_i32 = arith.constant 0 : i32
    %c0_i32_0 = arith.constant 0 : i32
    %c0_i32_1 = arith.constant 0 : i32
    return %c0_i32, %c0_i32_0 : i32, i32
  }
  func.func @transform_10(%arg0: i32) -> (i32, i32) {
    %c0_i32 = arith.constant 0 : i32
    %c0_i32_0 = arith.constant 0 : i32
    %c0_i32_1 = arith.constant 0 : i32
    return %c0_i32, %c0_i32_0 : i32, i32
  }
  func.func @transform_11(%arg0: i32) -> (i32, i32) {
    %c0_i32 = arith.constant 0 : i32
    %c0_i32_0 = arith.constant 0 : i32
    return %arg0, %c0_i32 : i32, i32
  }
}

</mosaic_0001>

<bundles_post_ra>
// kernel: newtonian_vae_v2_forward.3
= control target key start
LH: loop header
LB: loop body
LE: loop exit
PB: predicated region body
PF: predicated region fallthrough
CT: control target
= control target key end

     0   :  { %s1033_s17 = smov 0   ;;  %s1100_s0 = inlined_call_operand.vmem [shape: f32[16,4], index: 0, kind: input, shape index: {}]   ;;  %s1101_s1 = inlined_call_operand.vmem [shape: f32[16,4], index: 1, kind: input, shape index: {}]   ;;  %s1102_s2 = inlined_call_operand.vmem [shape: f32[16,4], index: 2, kind: input, shape index: {}]   ;;  %s1103_s3 = inlined_call_operand.vmem [shape: f32[16,4], index: 3, kind: input, shape index: {}]   ;;  %s1104_s4 = inlined_call_operand.vmem [shape: f32[16,4], index: 4, kind: input, shape index: {}]   ;;  %s1105_s5 = inlined_call_operand.vmem [shape: f32[16,4], index: 5, kind: input, shape index: {}]   ;;  %s1106_s6 = inlined_call_operand.vmem [shape: f32[16,4], index: 6, kind: input, shape index: {}]   ;;  %s1107_s7 = inlined_call_operand.vmem [shape: f32[4,4], index: 7, kind: input, shape index: {}]   ;;  %s1108_s8 = inlined_call_operand.vmem [shape: f32[4,4], index: 8, kind: input, shape index: {}]   ;;  %s1109_s9 = inlined_call_operand.vmem [shape: f32[4,4], index: 9, kind: input, shape index: {}]   ;;  %s1110_s10 = inlined_call_operand.vmem [shape: f32[1,4], index: 10, kind: input, shape index: {}]   ;;  %s1111_s11 = inlined_call_operand.vmem [shape: f32[16,128], index: 11, kind: output, shape index: {}]  }
   0x1 LB: > { %s901_s18 = sadd.s32 4294967295, %s969_s17   ;;  %p905_p0 = scmp.ge.s32.totalorder %s969_s17, 1  ;;  %s969_s17 = sphi %s1033_s17, %s21_s17  }
   0x2   : > { %p390_p1 = scmp.lt.s32.totalorder %s969_s17, 3 }
   0x4   : > { %p391_p2 = pnand %p905_p0, %p390_p1 }
   0x5   : > { %v492_v0 = vld [vmem:[%s1108_s8] sm:$0xf] (!%p391_p2)  ;;  %vm497_vm0 = vcmask (!%p391_p2), 1043456   ;;  %p452_p3 = scmp.lt.s32.totalorder (!%p391_p2), %s901_s18, 1  ;;  %v971_v1 = vmov (!%p391_p2), 0.0   ;;  %vm972_vm1 = vmmov (!%p391_p2), 0  }
   0x6   : > { %394 = sbr.rel (%p391_p2) target bundleno = 462 (0x1ce), region = 64  ;;  %930 = vmatprep.subr.mxu0 (!%p391_p2), %v971_v1  ;;  %935 = vmatprep.subr.mxu1 (!%p391_p2), %v971_v1  ;;  %v491_v2 = vld [vmem:[%s1107_s7] sm:$0xf] (!%p391_p2)  ;;  %vm493_vm2 = vcmask (!%p391_p2), 31744  }
   0x7   : > { %931 = vmatpush3.msk.msra.mxu0 (!%p391_p2), %vm497_vm0, %v492_v0  ;;  %932 = vmatprep.mubr.msk.f32.mxu0 (!%p391_p2), %vm972_vm1, %v971_v1  ;;  %v647_v8 = vld [vmem:[%s1109_s9] sm:$0xf] (!%p391_p2) }
   0x8   : > { %936 = vmatpush3.msk.msra.mxu1 (!%p391_p2), %vm497_vm0, %v491_v2  ;;  %937 = vmatprep.mubr.msk.f32.mxu1 (!%p391_p2), %vm972_vm1, %v971_v1  ;;  %v920_v16 = vld [vmem:[%s1110_s10] ss:$0 sm:$0xff] (!%p391_p2) }
   0x9   : > { %940 = vmatprep.subr.mxu0 (!%p391_p2), %v971_v1 }
   0xd   : > { %s1113_s18 = smov (!%p452_p3, %s901_s18), 1 }
   0xe   : > { %s1051_s23 = sshll.u32 %s1113_s18, 3 }
   0xf   : > { %s455_s26 = scalar_lea.vmem %s1100_s0, %s1051_s23  ;;  %s459_s29 = scalar_lea.vmem %s1101_s1, %s1051_s23 }
  0x10   : > { %s479_s13 = scalar_lea.vmem %s1106_s6, %s1051_s23  ;;  %v484_v3 = vld [vmem:[%s455_s26] sm:$0xff]  ;;  %s463_s19 = scalar_lea.vmem %s1102_s2, %s1051_s23 }
  0x11   : > { %v487_v4 = vld [vmem:[%s459_s29] sm:$0xff]  ;;  %938 = vmatmul.mubr.msk.f32.vlgmr.msra.gmra.mrb[0].mxu1 %vm493_vm2, %v484_v3  ;;  %s471_s25 = scalar_lea.vmem %s1104_s4, %s1051_s23  ;;  %s475_s28 = scalar_lea.vmem %s1105_s5, %s1051_s23 }
  0x12   : > { %v488_v5 = vsub.f32 %v484_v3, %v487_v4  ;;  %v489_v6 = vld [vmem:[%s479_s13] sm:$0xff]  ;;  %s467_s12 = scalar_lea.vmem %s1103_s3, %s1051_s23  ;;  %s483_s15 = scalar_lea.vmem %s1111_s11, %s1051_s23 }
  0x13   : > { %v485_v9 = vld [vmem:[%s463_s19] sm:$0xff] }
  0x14   : > { %v490_v7 = vmul.f32 %v489_v6, %v488_v5  ;;  %v761_v37 = vld [vmem:[%s471_s25] sm:$0xff] }
  0x15   : > { %v486_v42 = vld [vmem:[%s475_s28] sm:$0xff]  ;;  %v766_v52 = vmul.f32 %v761_v37, %v761_v37 }
  0x16   : > { %933 = vmatmul.mubr.msk.f32.vlgmr.msra.gmra.mrb[0].mxu0 %vm493_vm2, %v490_v7  ;;  %v760_v48 = vld [vmem:[%s467_s12] sm:$0xff] }
  0x17   : > { %941 = vmatpush3.msk.msra.mxu0 %vm497_vm0, %v647_v8  ;;  %942 = vmatprep.mubr.msk.f32.mxu0 %vm972_vm1, %v971_v1 }
  0x1a   : > { %943 = vmatmul.mubr.msk.f32.vlgmr.msra.gmra.mrb[2].mxu0 %vm493_vm2, %v485_v9 }
  0xe4   : > { %v643_v10 = vpop.f32.mrb[0].mxu1 }
  0xe5   : > { %v939_v11 = vpop.f32.mrb[1].mxu1 }
  0xe9   : > { %v567_v12 = vpop.f32.mrb[0].mxu0 }
  0xea   : > { %v644_v13 = vadd.f32 %v643_v10, %v567_v12  ;;  %v934_v14 = vpop.f32.mrb[1].mxu0 }
  0xed   : > { %v720_v15 = vpop.f32.mrb[2].mxu0 }
  0xee   : > { %v724_v17 = vadd.f32 %v720_v15, %v644_v13  ;;  %v944_v18 = vpop.f32.mrb[3].mxu0 }
  0xf0   : > { %v732_v19 = vadd.f32 %v920_v16, %v724_v17 }
  0xf2   : > { %v734_v20 = vand.u32 2147483647, %v732_v19  ;;  %v733_v31 = vmax.f32 %v732_v19, 0.0 }
  0xf4   : > { %v735_v21 = vsub.f32 0.0, %v734_v20 }
  0xf6   : > { %v736_v22 = vmul.f32 1.442695, %v735_v21 }
  0xf8   : > { %955 = vpow2.f32 %v736_v22 }
 0x102   : > { %v956_v23 = vpop.eup %955 }
 0x103   : > { %v738_v24 = vadd.f32 1.0, %v956_v23  ;;  %v741_v25 = vmul.f32 -0.5, %v956_v23  ;;  %v744_v27 = vand.u32 2147483647, %v956_v23 }
 0x105   : > { %957 = vlog2.f32 %v738_v24  ;;  %v742_v26 = vadd.f32 1.0, %v741_v25  ;;  %vm745_vm3 = vcmp.lt.f32.partialorder %v744_v27, 0.0004427343 }
 0x107   : > { %v743_v30 = vmul.f32 %v956_v23, %v742_v26 }
 0x10f   : > { %v958_v28 = vpop.eup %957 }
 0x110   : > { %v740_v29 = vmul.f32 0.6931472, %v958_v28 }
 0x112   : > { %v746_v32 = vsel %vm745_vm3, %v743_v30, %v740_v29 }
 0x113   : > { %v747_v33 = vadd.f32 %v746_v32, %v733_v31 }
 0x115   : > { %v748_v34 = vadd.f32 0.001, %v747_v33 }
 0x117   : > { %959 = vlog2.f32 %v748_v34  ;;  %v751_v38 = vmul.f32 %v748_v34, %v484_v3 }
 0x118   : > { %961 = vlog2.f32 %v761_v37 }
 0x121   : > { %v960_v35 = vpop.eup %959 }
 0x122   : > { %v750_v36 = vmul.f32 0.6931472, %v960_v35  ;;  %v962_v47 = vpop.eup %961 }
 0x123   : > { %v764_v51 = vmul.f32 0.6931472, %v962_v47 }
 0x124   : > { %v752_v39 = vmul.f32 %v750_v36, %v490_v7  ;;  %v754_v41 = vmul.f32 %v750_v36, %v485_v9 }
 0x125   : > { %v765_v54 = vsub.f32 -2.3025851, %v764_v51 }
 0x126   : > { %v753_v40 = vsub.f32 %v751_v38, %v752_v39 }
 0x128   : > { %v755_v43 = vadd.f32 %v754_v41, %v753_v40 }
 0x12a   : > { %v756_v44 = vmul.f32 %v755_v43, %v486_v42 }
 0x12c   : > { %v757_v45 = vadd.f32 %v756_v44, %v490_v7 }
 0x12e   : > { %v758_v46 = vmul.f32 %v757_v45, %v486_v42 }
 0x130   : > { %v759_v49 = vadd.f32 %v758_v46, %v484_v3 }
 0x132   : > { %v762_v50 = vsub.f32 %v760_v48, %v759_v49 }
 0x134   : > { %v767_v53 = vmul.f32 %v762_v50, %v762_v50 }
 0x136   : > { %v768_v55 = vadd.f32 %v767_v53, %v766_v52 }
 0x138   : > { %v769_v56 = vmul.f32 50.0, %v768_v55 }
 0x13a   : > { %v770_v57 = vadd.f32 %v769_v56, %v765_v54 }
 0x13c   : > { %v921_v58 = vadd.f32 -0.5, %v770_v57 }
 0x13e   : > { %v772_v59 = vsel %vm493_vm2, %v921_v58, 0.0 }
 0x13f   : > { %773 = vadd.xlane.f32.xlu0 %v772_v59 }
 0x1cc   : > { %v774_v60 = vpop.xlane.xlu0 %773 }
 0x1cd   : > { %775 = vst [vmem:[%s483_s15] sm:$0xff] %v774_v60 }
 0x1ce PF: > { %s21_s17 = sadd.s32 1, %s969_s17  }
 0x1cf   : > { %p18_p4 = scmp.ge.s32.totalorder %s21_s17, 4  }
 0x1d1   :  { %20 = sbr.rel (!%p18_p4) target bundleno = 1 (0x1), region = 112 }

// kernel: newtonian_vae_v2_forward.2
= control target key start
LH: loop header
LB: loop body
LE: loop exit
PB: predicated region body
PF: predicated region fallthrough
CT: control target
= control target key end

     0   :  { %s1388_s8 = smov 4   ;;  %vm31_vm0 = vcmask 97280   ;;  %vm965_vm1 = vcmask 1043456   ;;  %vm958_vm4 = vcmask 31744   ;;  %vm1125_vm5 = vcmask 64512   ;;  %s1793_s1 = inlined_call_operand.vmem [shape: bf16[1024,12], index: 1, kind: input, shape index: {}]   ;;  %s1794_s0 = inlined_call_operand.vmem [shape: bf16[16,1024], index: 0, kind: input, shape index: {}]   ;;  %s1795_s4 = inlined_call_operand.vmem [shape: f32[16,4], index: 4, kind: input, shape index: {}]   ;;  %s1796_s5 = inlined_call_operand.vmem [shape: f32[4,4], index: 5, kind: input, shape index: {}]   ;;  %s1797_s3 = inlined_call_operand.vmem [shape: f32[1,1024], index: 3, kind: input, shape index: {}]   ;;  %s1798_s2 = inlined_call_operand.vmem [shape: f32[1,8], index: 2, kind: input, shape index: {}]   ;;  %s1799_s6 = inlined_call_operand.vmem [shape: f32[1,4], index: 6, kind: input, shape index: {}]   ;;  %s1800_s7 = inlined_call_operand.vmem [shape: f32[16,128], index: 7, kind: output, shape index: {}]  }
   0x1   :  { %v1316_v0 = vld [vmem:[%s1793_s1 + $0x40] sm:$0xff]   ;;  %v1320_v4 = vld [vmem:[%s1793_s1 + $0x48] sm:$0xff]   ;;  %v1324_v8 = vld [vmem:[%s1793_s1 + $0x50] sm:$0xff]  }
   0x2   :  { %v1317_v1 = vld [vmem:[%s1793_s1 + $0xc0] sm:$0xff]   ;;  %1213 = vmatprep.subr.bf16.mxu0 %v1316_v0  ;;  %v1321_v5 = vld [vmem:[%s1793_s1 + $0xc8] sm:$0xff]   ;;  %v1325_v9 = vld [vmem:[%s1793_s1 + $0xd0] sm:$0xff]  }
   0x3   :  { %v1318_v2 = vld [vmem:[%s1793_s1] sm:$0xff]   ;;  %1235 = vmatprep.subr.bf16.mxu1 %v1317_v1  ;;  %v1322_v6 = vld [vmem:[%s1793_s1 + $0x8] sm:$0xff]   ;;  %v1326_v10 = vld [vmem:[%s1793_s1 + $0x10] sm:$0xff]  }
   0x4   :  { %v1319_v3 = vld [vmem:[%s1793_s1 + $0x80] sm:$0xff]   ;;  %1214 = vmatpush3.bf16.msra.mxu0 %v1318_v2  ;;  %v1323_v7 = vld [vmem:[%s1793_s1 + $0x88] sm:$0xff]   ;;  %v1327_v11 = vld [vmem:[%s1793_s1 + $0x90] sm:$0xff]  }
   0x5   :  { %1236 = vmatpush3.bf16.msra.mxu1 %v1319_v3  ;;  %1215 = vmatprep.subr.bf16.mxu0 %v1320_v4  ;;  %v1328_v12 = vld [vmem:[%s1793_s1 + $0x58] sm:$0xff]   ;;  %v1332_v16 = vld [vmem:[%s1793_s1 + $0x60] sm:$0xff]   ;;  %v1336_v20 = vld [vmem:[%s1793_s1 + $0x68] sm:$0xff]  }
   0x6   :  { %1237 = vmatprep.subr.bf16.mxu1 %v1321_v5  ;;  %v1329_v13 = vld [vmem:[%s1793_s1 + $0xd8] sm:$0xff]   ;;  %v1333_v17 = vld [vmem:[%s1793_s1 + $0xe0] sm:$0xff]   ;;  %v1337_v21 = vld [vmem:[%s1793_s1 + $0xe8] sm:$0xff]  }
   0x7   :  { %v1330_v14 = vld [vmem:[%s1793_s1 + $0x18] sm:$0xff]   ;;  %v1334_v18 = vld [vmem:[%s1793_s1 + $0x20] sm:$0xff]   ;;  %v1338_v22 = vld [vmem:[%s1793_s1 + $0x28] sm:$0xff]  }
   0x8   :  { %1216 = vmatpush3.bf16.msra.mxu0 %v1322_v6  ;;  %v1331_v15 = vld [vmem:[%s1793_s1 + $0x98] sm:$0xff]   ;;  %v1335_v19 = vld [vmem:[%s1793_s1 + $0xa0] sm:$0xff]   ;;  %v1339_v23 = vld [vmem:[%s1793_s1 + $0xa8] sm:$0xff]  }
   0x9   :  { %1238 = vmatpush3.bf16.msra.mxu1 %v1323_v7  ;;  %1217 = vmatprep.subr.bf16.mxu0 %v1324_v8  ;;  %v1340_v24 = vld [vmem:[%s1793_s1 + $0x70] sm:$0xff]   ;;  %v1344_v28 = vld [vmem:[%s1793_s1 + $0x78] sm:$0xff]   ;;  %v1532_v32 = vld [vmem:[%s1794_s0] sm:$0xff] }
   0xa   :  { %1239 = vmatprep.subr.bf16.mxu1 %v1325_v9  ;;  %v1341_v25 = vld [vmem:[%s1793_s1 + $0xf0] sm:$0xff]   ;;  %v1345_v29 = vld [vmem:[%s1793_s1 + $0xf8] sm:$0xff]   ;;  %v1537_v33 = vld [vmem:[%s1794_s0 + $0x20] sm:$0xff] }
   0xb   :  { %v1342_v26 = vld [vmem:[%s1793_s1 + $0x30] sm:$0xff]   ;;  %v1346_v30 = vld [vmem:[%s1793_s1 + $0x38] sm:$0xff]   ;;  %v1542_v34 = vld [vmem:[%s1794_s0 + $0x8] sm:$0xff]  ;;  %v1136_v35 = vcombine.low %v1532_v32, %v1537_v33  ;;  %v1137_v36 = vcombine.high %v1532_v32, %v1537_v33 }
   0xc   :  { %1218 = vmatpush3.bf16.msra.mxu0 %v1326_v10  ;;  %v1343_v27 = vld [vmem:[%s1793_s1 + $0xb0] sm:$0xff]   ;;  %v1347_v31 = vld [vmem:[%s1793_s1 + $0xb8] sm:$0xff]   ;;  %v1551_v37 = vld [vmem:[%s1794_s0 + $0x28] sm:$0xff] }
   0xd   :  { %1240 = vmatpush3.bf16.msra.mxu1 %v1327_v11  ;;  %1219 = vmatprep.subr.bf16.mxu0 %v1328_v12  ;;  %v1138_v38 = vcombine.low %v1542_v34, %v1551_v37  ;;  %v1139_v39 = vcombine.high %v1542_v34, %v1551_v37  ;;  %v1348_v40 = vld [vmem:[%s1793_s1 + $0x140] sm:$0xff]   ;;  %v1352_v44 = vld [vmem:[%s1793_s1 + $0x148] sm:$0xff]   ;;  %v1356_v48 = vld [vmem:[%s1793_s1 + $0x150] sm:$0xff]  }
   0xe   :  { %1241 = vmatprep.subr.bf16.mxu1 %v1329_v13  ;;  %630 = vmatprep.mubr.bf16.mxu0 %v1137_v36  ;;  %v1349_v41 = vld [vmem:[%s1793_s1 + $0x1c0] sm:$0xff]   ;;  %v1353_v45 = vld [vmem:[%s1793_s1 + $0x1c8] sm:$0xff]   ;;  %v1357_v49 = vld [vmem:[%s1793_s1 + $0x1d0] sm:$0xff]  }
   0xf   :  { %671 = vmatprep.mubr.bf16.mxu1 %v1139_v39  ;;  %v1350_v42 = vld [vmem:[%s1793_s1 + $0x100] sm:$0xff]   ;;  %v1354_v46 = vld [vmem:[%s1793_s1 + $0x108] sm:$0xff]   ;;  %v1358_v50 = vld [vmem:[%s1793_s1 + $0x110] sm:$0xff]  }
  0x10   :  { %1220 = vmatpush3.bf16.msra.mxu0 %v1330_v14  ;;  %v1351_v43 = vld [vmem:[%s1793_s1 + $0x180] sm:$0xff]   ;;  %v1355_v47 = vld [vmem:[%s1793_s1 + $0x188] sm:$0xff]   ;;  %v1359_v51 = vld [vmem:[%s1793_s1 + $0x190] sm:$0xff]  }
  0x11   :  { %1242 = vmatpush3.bf16.msra.mxu1 %v1331_v15  ;;  %1221 = vmatprep.subr.bf16.mxu0 %v1332_v16  ;;  %v1360_v52 = vld [vmem:[%s1793_s1 + $0x158] sm:$0xff]   ;;  %v1364_v56 = vld [vmem:[%s1793_s1 + $0x160] sm:$0xff]   ;;  %v1368_v60 = vld [vmem:[%s1793_s1 + $0x168] sm:$0xff]  }
  0x12   :  { %1243 = vmatprep.subr.bf16.mxu1 %v1333_v17  ;;  %v1361_v53 = vld [vmem:[%s1793_s1 + $0x1d8] sm:$0xff]   ;;  %v1365_v57 = vld [vmem:[%s1793_s1 + $0x1e0] sm:$0xff]   ;;  %v1369_v61 = vld [vmem:[%s1793_s1 + $0x1e8] sm:$0xff]  }
  0x13   :  { %v1362_v54 = vld [vmem:[%s1793_s1 + $0x118] sm:$0xff]   ;;  %v1366_v58 = vld [vmem:[%s1793_s1 + $0x120] sm:$0xff]   ;;  %v1370_v62 = vld [vmem:[%s1793_s1 + $0x128] sm:$0xff]  }
  0x14   :  { %1222 = vmatpush3.bf16.msra.mxu0 %v1334_v18  ;;  %v1363_v55 = vld [vmem:[%s1793_s1 + $0x198] sm:$0xff]   ;;  %v1367_v59 = vld [vmem:[%s1793_s1 + $0x1a0] sm:$0xff]   ;;  %v1371_v63 = vld [vmem:[%s1793_s1 + $0x1a8] sm:$0xff]   ;;  %v1389_v18 = vmov 0.0  }
  0x15   :  { %1244 = vmatpush3.bf16.msra.mxu1 %v1335_v19  ;;  %1223 = vmatprep.subr.bf16.mxu0 %v1336_v20  ;;  %v1372_v0 = vld [vmem:[%s1793_s1 + $0x170] sm:$0xff]   ;;  %v1376_v4 = vld [vmem:[%s1793_s1 + $0x178] sm:$0xff]   ;;  %v935_v14 = vld [vmem:[%s1795_s4] sm:$0xff]  ;;  %32 = vst.msk [vmem:[#allocation2] sm:$0xff] %vm31_vm0, %v1389_v18 }
  0x16   :  { %1245 = vmatprep.subr.bf16.mxu1 %v1337_v21  ;;  %v1373_v1 = vld [vmem:[%s1793_s1 + $0x1f0] sm:$0xff]   ;;  %v1377_v5 = vld [vmem:[%s1793_s1 + $0x1f8] sm:$0xff]   ;;  %939 = vrot.lane.b32.xlu0 %v935_v14, %s1388_s8  ;;  %v936_v17 = vld [vmem:[%s1795_s4 + $0x8] sm:$0xff]  ;;  %33 = vst.msk [vmem:[#allocation2 + $0x8] sm:$0xff] %vm31_vm0, %v1389_v18 }
  0x17   :  { %v1374_v2 = vld [vmem:[%s1793_s1 + $0x130] sm:$0xff]   ;;  %v1378_v6 = vld [vmem:[%s1793_s1 + $0x138] sm:$0xff]  }
  0x18   :  { %1224 = vmatpush3.bf16.msra.mxu0 %v1338_v22  ;;  %v1375_v3 = vld [vmem:[%s1793_s1 + $0x1b0] sm:$0xff]   ;;  %v1379_v7 = vld [vmem:[%s1793_s1 + $0x1b8] sm:$0xff]  }
  0x19   :  { %1246 = vmatpush3.bf16.msra.mxu1 %v1339_v23  ;;  %1225 = vmatprep.subr.bf16.mxu0 %v1340_v24  ;;  %v1656_v8 = vld [vmem:[%s1794_s0 + $0x10] sm:$0xff]  ;;  %v1670_v12 = vld [vmem:[%s1794_s0 + $0x18] sm:$0xff] }
  0x1a   :  { %1247 = vmatprep.subr.bf16.mxu1 %v1341_v25  ;;  %v1661_v9 = vld [vmem:[%s1794_s0 + $0x30] sm:$0xff]  ;;  %v1675_v13 = vld [vmem:[%s1794_s0 + $0x38] sm:$0xff]  ;;  %941 = vrot.lane.b32.xlu0 %v936_v17, %s1388_s8 }
  0x1b   :  { %v1140_v10 = vcombine.low %v1656_v8, %v1661_v9  ;;  %v1141_v11 = vcombine.high %v1656_v8, %v1661_v9  ;;  %v1142_v15 = vcombine.low %v1670_v12, %v1675_v13  ;;  %v1143_v16 = vcombine.high %v1670_v12, %v1675_v13 }
  0x1c   :  { %1226 = vmatpush3.bf16.msra.mxu0 %v1342_v26 }
  0x1d   :  { %1248 = vmatpush3.bf16.msra.mxu1 %v1343_v27  ;;  %1227 = vmatprep.subr.bf16.mxu0 %v1344_v28 }
  0x1e   :  { %1249 = vmatprep.subr.bf16.mxu1 %v1345_v29 }
  0x20   :  { %1228 = vmatpush3.bf16.msra.mxu0 %v1346_v30 }
  0x21   :  { %1250 = vmatpush3.bf16.msra.mxu1 %v1347_v31  ;;  %1257 = vmatprep.subr.bf16.mxu0 %v1348_v40 }
  0x22   :  { %1279 = vmatprep.subr.bf16.mxu1 %v1349_v41 }
  0x23   :  { %631 = vmatmul.mubr.bf16.vlgmr.msra.gmra.mrb[0].mxu0 %v1136_v35 }
  0x24   :  { %672 = vmatmul.mubr.bf16.vlgmr.msra.gmra.mrb[0].mxu1 %v1138_v38  ;;  %1258 = vmatpush3.bf16.msra.mxu0 %v1350_v42 }
  0x25   :  { %1280 = vmatpush3.bf16.msra.mxu1 %v1351_v43  ;;  %1259 = vmatprep.subr.bf16.mxu0 %v1352_v44 }
  0x26   :  { %1281 = vmatprep.subr.bf16.mxu1 %v1353_v45  ;;  %712 = vmatprep.mubr.bf16.mxu0 %v1141_v11  ;;  %v778_v11 = vunpack.c.h.bf16 %v1542_v34 }
  0x27   :  { %753 = vmatprep.mubr.bf16.mxu1 %v1143_v16 }
  0x28   :  { %1260 = vmatpush3.bf16.msra.mxu0 %v1354_v46 }
  0x29   :  { %1282 = vmatpush3.bf16.msra.mxu1 %v1355_v47  ;;  %1261 = vmatprep.subr.bf16.mxu0 %v1356_v48 }
  0x2a   :  { %1283 = vmatprep.subr.bf16.mxu1 %v1357_v49  ;;  %v36_v49 = vld [vmem:[#allocation2] sm:$0xff] }
  0x2c   :  { %1262 = vmatpush3.bf16.msra.mxu0 %v1358_v50 }
  0x2d   :  { %1284 = vmatpush3.bf16.msra.mxu1 %v1359_v51  ;;  %1263 = vmatprep.subr.bf16.mxu0 %v1360_v52  ;;  %v957_v51 = vld [vmem:[%s1796_s5] sm:$0xf] }
  0x2e   :  { %1285 = vmatprep.subr.bf16.mxu1 %v1361_v53 }
  0x30   :  { %1264 = vmatpush3.bf16.msra.mxu0 %v1362_v54  ;;  %v37_v54 = vld [vmem:[#allocation2 + $0x8] sm:$0xff] }
  0x31   :  { %1286 = vmatpush3.bf16.msra.mxu1 %v1363_v55  ;;  %1265 = vmatprep.subr.bf16.mxu0 %v1364_v56  ;;  %v793_v55 = vlaneseq }
  0x32   :  { %1287 = vmatprep.subr.bf16.mxu1 %v1365_v57 }
  0x34   :  { %1266 = vmatpush3.bf16.msra.mxu0 %v1366_v58  ;;  %v1694_v58 = vshrl.u32 %v793_v55, 7 }
  0x35   :  { %1288 = vmatpush3.bf16.msra.mxu1 %v1367_v59  ;;  %1267 = vmatprep.subr.bf16.mxu0 %v1368_v60  ;;  %v775_v60 = vunpack.c.l.bf16 %v1532_v32 }
  0x36   :  { %1289 = vmatprep.subr.bf16.mxu1 %v1369_v61  ;;  %v791_v61 = vld [vmem:[%s1797_s3] sm:$0xff]  ;;  %v811_v14 = vsub.s32 4, %v1694_v58  ;;  %s1390_s3 = smov 120  }
  0x38   :  { %1268 = vmatpush3.bf16.msra.mxu0 %v1370_v62  ;;  %v776_v62 = vunpack.c.h.bf16 %v1532_v32 }
  0x39   :  { %1290 = vmatpush3.bf16.msra.mxu1 %v1371_v63  ;;  %1269 = vmatprep.subr.bf16.mxu0 %v1372_v0  ;;  %v795_v63 = vsub.s32 0, %v1694_v58  ;;  %v799_v0 = vsub.s32 1, %v1694_v58 }
  0x3a   :  { %1291 = vmatprep.subr.bf16.mxu1 %v1373_v1  ;;  %v803_v1 = vsub.s32 2, %v1694_v58 }
  0x3c   :  { %1270 = vmatpush3.bf16.msra.mxu0 %v1374_v2  ;;  %v777_v2 = vunpack.c.l.bf16 %v1542_v34  ;;  %v779_v34 = vunpack.c.l.bf16 %v1656_v8 }
  0x3d   :  { %1292 = vmatpush3.bf16.msra.mxu1 %v1375_v3  ;;  %1271 = vmatprep.subr.bf16.mxu0 %v1376_v4  ;;  %v796_v3 = vrot.slane %v791_v61, %v795_v63  ;;  %v800_v4 = vrot.slane %v791_v61, %v799_v0 }
  0x3e   :  { %1293 = vmatprep.subr.bf16.mxu1 %v1377_v5  ;;  %v804_v5 = vrot.slane %v791_v61, %v803_v1 }
  0x3f   :  { %v833_v32 = vsub.f32 %v775_v60, %v796_v3 }
  0x40   :  { %1272 = vmatpush3.bf16.msra.mxu0 %v1378_v6  ;;  %v807_v6 = vsub.s32 3, %v1694_v58  ;;  %v835_v17 = vsub.f32 %v777_v2, %v804_v5 }
  0x41   :  { %1294 = vmatpush3.bf16.msra.mxu1 %v1379_v7  ;;  %1304 = vmatprep.subr.msk.mxu0 %vm965_vm1, %v957_v51  ;;  %v1208_v7 = vld [vmem:[%s1798_s2] ss:$0 sm:$0xff]  ;;  %v851_v18 = vmul.f32 %v833_v32, %v833_v32  ;;  %s1391_s2 = smov 124  }
  0x42   :  { %v808_v16 = vrot.slane %v791_v61, %v807_v6 }
  0x43   :  { %713 = vmatmul.mubr.bf16.vlgmr.msra.gmra.mrb[4].mxu0 %v1140_v10  ;;  %v834_v10 = vsub.f32 %v776_v62, %v800_v4 }
  0x44   :  { %754 = vmatmul.mubr.bf16.vlgmr.msra.gmra.mrb[4].mxu1 %v1142_v15  ;;  %1305 = vmatpush3.msk.msra.mxu0 %vm965_vm1, %v957_v51  ;;  %v785_v51 = vunpack.c.l.bf16 %v1551_v37 }
  0xf6   :  { %v1229_v19 = vpop.f32.mrb[0].mxu0 }
  0xf7   :  { %v1251_v20 = vpop.f32.mrb[0].mxu1  ;;  %v1230_v21 = vpop.f32.mrb[1].mxu0 }
  0xf8   :  { %v1231_v22 = vadd.f32 %v1230_v21, %v1229_v19  ;;  %v1252_v23 = vpop.f32.mrb[1].mxu1  ;;  %v1232_v24 = vpop.f32.mrb[2].mxu0  ;;  %v852_v19 = vmul.f32 %v834_v10, %v834_v10 }
  0xf9   :  { %v1253_v25 = vadd.f32 %v1252_v23, %v1251_v20  ;;  %v1254_v26 = vpop.f32.mrb[2].mxu1  ;;  %v1233_v27 = vpop.f32.mrb[3].mxu0 }
  0xfa   :  { %v1234_v28 = vadd.f32 %v1233_v27, %v1232_v24  ;;  %v1255_v29 = vpop.f32.mrb[3].mxu1  ;;  %v815_v24 = vsub.s32 5, %v1694_v58  ;;  %v853_v27 = vmul.f32 %v835_v17, %v835_v17 }
  0xfb   :  { %v674_v30 = vadd.f32 %v1253_v25, %v1231_v22  ;;  %v1256_v31 = vadd.f32 %v1255_v29, %v1254_v26  ;;  %v812_v25 = vrot.slane %v791_v61, %v811_v14  ;;  %v836_v26 = vsub.f32 %v778_v11, %v808_v16 }
  0xfc   :  { %v789_v11 = vunpack.c.l.bf16 %v1675_v13 }
  0xfd   :  { %v677_v35 = vadd.f32 %v1256_v31, %v1234_v28  ;;  %v867_v28 = vadd.f32 %v852_v19, %v851_v18  ;;  %v790_v19 = vunpack.c.h.bf16 %v1675_v13 }
 0x116   :  { %v1273_v36 = vpop.f32.mrb[4].mxu0 }
 0x117   :  { %v1295_v38 = vpop.f32.mrb[4].mxu1  ;;  %v1274_v39 = vpop.f32.mrb[5].mxu0 }
 0x118   :  { %v1275_v40 = vadd.f32 %v1274_v39, %v1273_v36  ;;  %v1296_v41 = vpop.f32.mrb[5].mxu1  ;;  %v1276_v42 = vpop.f32.mrb[6].mxu0  ;;  %v780_v36 = vunpack.c.h.bf16 %v1656_v8  ;;  %v816_v39 = vrot.slane %v791_v61, %v815_v24 }
 0x119   :  { %v1297_v43 = vadd.f32 %v1296_v41, %v1295_v38  ;;  %v1298_v44 = vpop.f32.mrb[6].mxu1  ;;  %v1277_v45 = vpop.f32.mrb[7].mxu0  ;;  %v819_v38 = vsub.s32 6, %v1694_v58  ;;  %v854_v41 = vmul.f32 %v836_v26, %v836_v26 }
 0x11a   :  { %v715_v46 = vadd.f32 %v1275_v40, %v674_v30  ;;  %v1278_v47 = vadd.f32 %v1277_v45, %v1276_v42  ;;  %v1299_v48 = vpop.f32.mrb[7].mxu1  ;;  %v837_v40 = vsub.f32 %v779_v34, %v812_v25  ;;  %v868_v42 = vadd.f32 %v867_v28, %v853_v27 }
 0x11b   :  { %v1300_v50 = vadd.f32 %v1299_v48, %v1298_v44  ;;  %v823_v44 = vsub.s32 7, %v1694_v58  ;;  %v781_v45 = vunpack.c.l.bf16 %v1670_v12  ;;  %v820_v48 = vrot.slane %v791_v61, %v819_v38 }
 0x11c   :  { %v756_v52 = vadd.f32 %v1297_v43, %v715_v46  ;;  %v718_v53 = vadd.f32 %v1278_v47, %v677_v35  ;;  %v783_v46 = vunpack.c.l.bf16 %v1537_v33  ;;  %v784_v47 = vunpack.c.h.bf16 %v1537_v33 }
 0x11d   :  { %v855_v8 = vmul.f32 %v837_v40, %v837_v40  ;;  %v824_v55 = vrot.slane %v791_v61, %v823_v44  ;;  %v839_v60 = vsub.f32 %v781_v45, %v820_v48  ;;  %v787_v33 = vunpack.c.l.bf16 %v1661_v9 }
 0x11e   :  { %v762_v56 = vadd.f32 %v756_v52, %v36_v49  ;;  %v759_v57 = vadd.f32 %v1300_v50, %v718_v53  ;;  %v838_v49 = vsub.f32 %v780_v36, %v816_v39  ;;  %v869_v50 = vadd.f32 %v868_v42, %v854_v41 }
 0x11f   :  { %v841_v52 = vsub.f32 %v783_v46, %v796_v3  ;;  %v842_v53 = vsub.f32 %v784_v47, %v800_v4  ;;  %v788_v3 = vunpack.c.h.bf16 %v1661_v9  ;;  %v845_v4 = vsub.f32 %v787_v33, %v812_v25  ;;  %v940_v46 = vpop.permute.xlu0 %939 }
 0x120   :  { %765 = vst.msk [vmem:[#allocation2] sm:$0xff] %vm31_vm0, %v762_v56  ;;  %v763_v59 = vadd.f32 %v759_v57, %v37_v54  ;;  %v782_v54 = vunpack.c.h.bf16 %v1670_v12  ;;  %v786_v56 = vunpack.c.h.bf16 %v1551_v37  ;;  %v843_v57 = vsub.f32 %v785_v51, %v804_v5 }
 0x121   :  { %v859_v58 = vmul.f32 %v841_v52, %v841_v52  ;;  %v856_v62 = vmul.f32 %v838_v49, %v838_v49  ;;  %v870_v63 = vadd.f32 %v869_v50, %v855_v8  ;;  %v857_v37 = vmul.f32 %v839_v60, %v839_v60 }
 0x122   :  { %766 = vst.msk [vmem:[#allocation2 + $0x8] sm:$0xff] %vm31_vm0, %v763_v59  ;;  %v860_v59 = vmul.f32 %v842_v53, %v842_v53  ;;  %v844_v0 = vsub.f32 %v786_v56, %v808_v16  ;;  %v861_v1 = vmul.f32 %v843_v57, %v843_v57  ;;  %v840_v6 = vsub.f32 %v782_v54, %v824_v55 }
 0x123   :  { %v871_v5 = vadd.f32 %v870_v63, %v856_v62  ;;  %v846_v14 = vsub.f32 %v788_v3, %v816_v39  ;;  %v848_v26 = vsub.f32 %v790_v19, %v824_v55  ;;  %v942_v56 = vpop.permute.xlu0 %941 }
 0x124   :  { %v876_v2 = vadd.f32 %v860_v59, %v859_v58  ;;  %v862_v12 = vmul.f32 %v844_v0, %v844_v0  ;;  %v858_v18 = vmul.f32 %v840_v6, %v840_v6 }
 0x125   :  { %v872_v9 = vadd.f32 %v871_v5, %v857_v37  ;;  %v864_v34 = vmul.f32 %v846_v14, %v846_v14  ;;  %v1392_v14 = vmov 0  }
 0x126   :  { %v877_v61 = vadd.f32 %v876_v2, %v861_v1  ;;  %1314 = vset.pattern.permute.xlu0 %v1392_v14  ;;  %1315 = vset.pattern.permute.xlu1 %v1392_v14 }
 0x127   :  { %v892_v15 = vld [vmem:[#allocation2] sm:$0xff] }
 0x128   :  { %1054 = vrot.lane.b32.xlu0 %v892_v15, %s1390_s3  ;;  %v1714_v20 = vadd.f32 %v1208_v7, %v892_v15  ;;  %v863_v15 = vmul.f32 %v845_v4, %v845_v4  ;;  %v878_v17 = vadd.f32 %v877_v61, %v862_v12 }
 0x129   :  { %v1716_v21 = vld [vmem:[#allocation2 + $0x8] sm:$0xff] }
 0x12a   :  { %v1719_v22 = vadd.f32 %v1208_v7, %v1716_v21  ;;  %v905_v23 = vand.u32 2147483647, %v1714_v20  ;;  %v879_v24 = vadd.f32 %v878_v17, %v863_v15  ;;  %v903_v45 = vmax.f32 %v1714_v20, 0.0 }
 0x12c   :  { %v906_v29 = vand.u32 2147483647, %v1719_v22  ;;  %v907_v30 = vsub.f32 0.0, %v905_v23  ;;  %v847_v23 = vsub.f32 %v789_v11, %v820_v48  ;;  %v880_v28 = vadd.f32 %v879_v24, %v864_v34 }
 0x12d   :  { %v904_v50 = vmax.f32 %v1719_v22, 0.0 }
 0x12e   :  { %v908_v31 = vsub.f32 0.0, %v906_v29  ;;  %v909_v35 = vmul.f32 1.442695, %v907_v30  ;;  %v865_v27 = vmul.f32 %v847_v23, %v847_v23  ;;  %v873_v30 = vadd.f32 %v872_v9, %v858_v18 }
 0x130   :  { %v911_v43 = vmul.f32 1.442695, %v908_v31  ;;  %1380 = vpow2.f32 %v909_v35  ;;  %v866_v31 = vmul.f32 %v848_v26, %v848_v26  ;;  %v881_v35 = vadd.f32 %v880_v28, %v865_v27 }
 0x132   :  { %1382 = vpow2.f32 %v911_v43  ;;  %v882_v13 = vadd.f32 %v881_v35, %v866_v31 }
 0x13a   :  { %v1381_v7 = vpop.eup %1380 }
 0x13b   :  { %v913_v32 = vadd.f32 1.0, %v1381_v7  ;;  %v916_v25 = vmul.f32 -0.5, %v1381_v7  ;;  %v919_v38 = vand.u32 2147483647, %v1381_v7 }
 0x13c   :  { %v1383_v10 = vpop.eup %1382 }
 0x13d   :  { %1384 = vlog2.f32 %v913_v32  ;;  %v922_v16 = vadd.f32 1.0, %v1383_v10  ;;  %v925_v29 = vmul.f32 -0.5, %v1383_v10  ;;  %v917_v36 = vadd.f32 1.0, %v916_v25 }
 0x13e   :  { %v928_v41 = vand.u32 2147483647, %v1383_v10  ;;  %vm920_vm2 = vcmp.lt.f32.partialorder %v919_v38, 0.0004427343 }
 0x13f   :  { %1386 = vlog2.f32 %v922_v16  ;;  %v926_v39 = vadd.f32 1.0, %v925_v29  ;;  %v918_v43 = vmul.f32 %v1381_v7, %v917_v36 }
 0x140   :  { %vm929_vm3 = vcmp.lt.f32.partialorder %v928_v41, 0.0004427343 }
 0x141   :  { %v927_v49 = vmul.f32 %v1383_v10, %v926_v39 }
 0x147   :  { %v1385_v40 = vpop.eup %1384  ;;  %874 = vadd.xlane.f32.xlu0 %v873_v30 }
 0x148   :  { %v915_v42 = vmul.f32 0.6931472, %v1385_v40 }
 0x149   :  { %v1387_v44 = vpop.eup %1386 }
 0x14a   :  { %v921_v47 = vsel %vm920_vm2, %v918_v43, %v915_v42  ;;  %v924_v48 = vmul.f32 0.6931472, %v1387_v44 }
 0x14b   :  { %v931_v8 = vadd.f32 %v921_v47, %v903_v45  ;;  %883 = vadd.xlane.f32.xlu0 %v882_v13 }
 0x14c   :  { %v930_v51 = vsel %vm929_vm3, %v927_v49, %v924_v48 }
 0x14d   :  { %v1740_v52 = vadd.f32 0.001, %v931_v8  ;;  %v932_v53 = vadd.f32 %v930_v51, %v904_v50 }
 0x14f   :  { %v945_v54 = vmul.f32 %v940_v46, %v1740_v52  ;;  %v1743_v55 = vadd.f32 0.001, %v932_v53 }
 0x151   :  { %949 = vrot.lane.b32.xlu1 %v945_v54, %s1391_s2  ;;  %v946_v57 = vmul.f32 %v942_v56, %v1743_v55 }
 0x155   :  { %951 = vrot.lane.b32.xlu1 %v946_v57, %s1391_s2 }
 0x159   :  { %1056 = vrot.lane.b32.xlu1 %v1716_v21, %s1390_s3  ;;  %v1212_v21 = vld [vmem:[%s1799_s6] ss:$0 sm:$0xff] }
 0x19a   :  { %v1055_v60 = vpop.permute.xlu0 %1054 }
 0x1c3   :  { %v950_v58 = vpop.permute.xlu1 %949 }
 0x1c4   :  { %v1749_v59 = vadd.f32 %v950_v58, %v1714_v20 }
 0x1c6   :  { %1306 = vmatprep.mubr.msk.f32.mxu0 %vm958_vm4, %v1749_v59  ;;  %v1060_v62 = vmul.f32 %v1055_v60, %v1749_v59  ;;  %v1075_v4 = vmul.f32 %v1212_v21, %v1749_v59 }
 0x1c7   :  { %v952_v63 = vpop.permute.xlu1 %951 }
 0x1c8   :  { %v1755_v33 = vadd.f32 %v952_v63, %v1719_v22  ;;  %v1062_v0 = vsel %vm958_vm4, %v1060_v62, 0.0  ;;  %v1077_v12 = vsel %vm958_vm4, %v1075_v4, 0.0 }
 0x1c9   :  { %1063 = vadd.xlane.f32.xlu0 %v1062_v0 }
 0x1ca   :  { %1307 = vmatmul.mubr.msk.f32.vlgmr.msra.gmra.mrb[8].mxu0 %vm958_vm4, %v1755_v33  ;;  %v1076_v1 = vmul.f32 %v1212_v21, %v1755_v33 }
 0x1cb   :  { %v1057_v2 = vpop.permute.xlu1 %1056 }
 0x1cc   :  { %v1061_v6 = vmul.f32 %v1057_v2, %v1755_v33  ;;  %v1080_v7 = vsel %vm958_vm4, %v1076_v1, 0.0 }
 0x1cd   :  { %1081 = vadd.xlane.f32.xlu0 %v1080_v7 }
 0x1ce   :  { %v1065_v3 = vsel %vm958_vm4, %v1061_v6, 0.0 }
 0x1cf   :  { %1066 = vadd.xlane.f32.xlu1 %v1065_v3 }
 0x1d3   :  { %1078 = vadd.xlane.f32.xlu1 %v1077_v12 }
 0x1d4   :  { %v875_v15 = vpop.xlane.xlu0 %874 }
 0x1d8   :  { %v884_v17 = vpop.xlane.xlu0 %883 }
 0x256   :  { %v1064_v18 = vpop.xlane.xlu0 %1063 }
 0x257   :  { %v1085_v9 = vmul.f32 2.0, %v1064_v18 }
 0x259   :  { %v1087_v27 = vsub.f32 %v875_v15, %v1085_v9 }
 0x25a   :  { %v1082_v34 = vpop.xlane.xlu0 %1081 }
 0x25b   :  { %v1090_v26 = vmul.f32 2.0, %v1082_v34 }
 0x25c   :  { %v1067_v16 = vpop.xlane.xlu1 %1066 }
 0x25d   :  { %v1086_v19 = vmul.f32 2.0, %v1067_v16 }
 0x25f   :  { %v1088_v24 = vsub.f32 %v884_v17, %v1086_v19 }
 0x260   :  { %v1079_v23 = vpop.xlane.xlu1 %1078 }
 0x261   :  { %v1089_v25 = vmul.f32 2.0, %v1079_v23  ;;  %v1092_v28 = vadd.f32 %v1090_v26, %v1088_v24 }
 0x263   :  { %v1091_v29 = vadd.f32 %v1089_v25, %v1087_v27 }
 0x29d   :  { %v1308_v61 = vpop.f32.mrb[8].mxu0 }
 0x29e   :  { %v1045_v32 = vmul.f32 %v1308_v61, %v1755_v33  ;;  %v1035_v37 = vpop.f32.mrb[9].mxu0 }
 0x29f   :  { %v1044_v5 = vmul.f32 %v1035_v37, %v1749_v59 }
 0x2a0   :  { %v1049_v10 = vsel %vm958_vm4, %v1045_v32, 0.0 }
 0x2a1   :  { %1050 = vadd.xlane.f32.xlu0 %v1049_v10  ;;  %v1046_v11 = vsel %vm958_vm4, %v1044_v5, 0.0 }
 0x2a2   :  { %1047 = vadd.xlane.f32.xlu1 %v1046_v11 }
 0x2b3   :  { %1109 = vrot.lane.b32.xlu1 %v1714_v20, %s1388_s8 }
 0x2b7   :  { %1111 = vrot.lane.b32.xlu1 %v1719_v22, %s1388_s8 }
 0x32e   :  { %v1051_v20 = vpop.xlane.xlu0 %1050 }
 0x32f   :  { %v1094_v30 = vadd.f32 %v1092_v28, %v1051_v20  ;;  %v1048_v31 = vpop.xlane.xlu1 %1047 }
 0x330   :  { %v1093_v35 = vadd.f32 %v1091_v29, %v1048_v31 }
 0x331   :  { %v1096_v36 = vmul.f32 -0.5, %v1094_v30 }
 0x332   :  { %v1095_v22 = vmul.f32 -0.5, %v1093_v35 }
 0x333   :  { %1104 = vperm.xlu0 %1314, %v1096_v36   ;;  %v1110_v38 = vpop.permute.xlu1 %1109 }
 0x334   :  { %1099 = vperm.xlu1 %1315, %v1095_v22   ;;  %v1123_v41 = vsel %vm958_vm4, %v1749_v59, %v1110_v38 }
 0x337   :  { %v1112_v39 = vpop.permute.xlu1 %1111 }
 0x338   :  { %1117 = vrot.lane.b32.xlu1 %v1740_v52, %s1388_s8  ;;  %v1124_v44 = vsel %vm958_vm4, %v1755_v33, %v1112_v39 }
 0x33c   :  { %1119 = vrot.lane.b32.xlu1 %v1743_v55, %s1388_s8 }
 0x3b2   :  { %v1105_v46 = vpop.permute.xlu0 %1104 }
 0x3b3   :  { %v1100_v40 = vpop.permute.xlu1 %1099 }
 0x3b7   :  { %v1118_v13 = vpop.permute.xlu1 %1117 }
 0x3b8   :  { %v1126_v42 = vsel %vm1125_vm5, %v1123_v41, %v1118_v13 }
 0x3b9   :  { %v1128_v43 = vsel %vm31_vm0, %v1126_v42, %v1100_v40 }
 0x3ba   :  { %1130 = vst [vmem:[%s1800_s7] sm:$0xff] %v1128_v43 }
 0x3bb   :  { %v1120_v45 = vpop.permute.xlu1 %1119 }
 0x3bc   :  { %v1127_v47 = vsel %vm1125_vm5, %v1124_v44, %v1120_v45 }
 0x3bd   :  { %v1129_v48 = vsel %vm31_vm0, %v1127_v47, %v1105_v46 }
 0x3be   :  { %1131 = vst [vmem:[%s1800_s7 + $0x8] sm:$0xff] %v1129_v48 }

</bundles_post_ra>
